<compile_context>
chip_gen: v7x
topology: tpu7x:2x2x1
jax: 0.10.0
libtpu: 0.0.40
codegen_flags: <defaults>
</compile_context>

<pallas_src>
import functools

import jax
import jax.numpy as jnp
from jax.experimental import pallas as pl
from jax.experimental.pallas import tpu as pltpu


_SUBLANE = 8                 # batch tiles / feature dims rounded to this
_MAX_BATCH_TILE = 8192       # upper bound on rows per grid step
_MIN_GRID_TILES = 2          # keep >=2 grid steps when possible (v7x: 2 TCs)
_STEP_OVERHEAD_ROWS = 512    # ~0.35us per grid step expressed in "row equivalents"


def _round_up(x, m):
    return ((x + m - 1) // m) * m


def _physical_vmem_bytes():
    """Best-effort query of per-core physical VMEM; conservative fallback."""
    try:
        info = pltpu.get_tpu_info()
        for attr in ("vmem_capacity_bytes", "vmem_bytes", "vmem_size_bytes"):
            v = getattr(info, attr, None)
            if v:
                return int(v)
    except Exception:
        pass
    return 64 << 20          # v7x per-TC physical VMEM (smallest current part)


def _vmem_limit_bytes():
    # Use up to half of physical VMEM (64 MiB on 128-MiB parts, 32 MiB on v7x).
    return int(min(_physical_vmem_bytes() // 2, 64 << 20))


def _make_fused_fc_kernel(num_layers):
    """Kernel computing relu(... relu(x @ W0 + b0) ... @ W_{L-1} + b_{L-1})."""

    def kernel(*refs):
        # refs = (x_ref, w0_ref, b0_ref, w1_ref, b1_ref, ..., o_ref)
        x_ref = refs[0]
        o_ref = refs[1 + 2 * num_layers]
        h = x_ref[...].astype(jnp.float32)
        for k in range(num_layers):              # static loop -> fully unrolled
            w = refs[1 + 2 * k][...]
            b = refs[2 + 2 * k][...]
            lhs = h if w.dtype == jnp.float32 else h.astype(w.dtype)
            y = jnp.dot(lhs, w, preferred_element_type=jnp.float32)
            y = y + b.astype(jnp.float32)        # bias broadcast over batch tile
            h = jnp.maximum(y, 0.0)              # activation = F.relu
        o_ref[...] = h.astype(o_ref.dtype)       # single store at true width

    return kernel


def _choose_batch_tile(B, dims8, x_itemsize, param_itemsize, vmem_budget):
    """Pick the batch tile minimizing (padded rows + per-step overhead) under VMEM."""
    b_pad8 = _round_up(B, _SUBLANE)
    d_in, d_out, d_max = dims8[0], dims8[-1], max(dims8)

    # Weights/biases stay resident (constant index_map) but Pallas still
    # allocates 2 buffers per input spec by default -> count them twice.
    resident = 2 * sum(di * do + do
                       for di, do in zip(dims8[:-1], dims8[1:])) * param_itemsize

    cap = min(_MAX_BATCH_TILE, b_pad8)
    if _MIN_GRID_TILES >= 2 and b_pad8 >= 2 * _SUBLANE:
        # Ensure at least 2 grid steps so both v7x TensorCores get work.
        cap = min(cap, _round_up(pl.cdiv(b_pad8, 2), _SUBLANE))
    cap = max(cap, _SUBLANE)

    def footprint(tb):
        io = 2 * tb * d_in * x_itemsize + 2 * tb * d_out * x_itemsize  # dbl-buffered
        live = tb * (d_in + 2 * d_max) * 4                              # f32 live vals
        return resident + io + live

    best_tb, best_cost = _SUBLANE, None
    for tb in range(_SUBLANE, cap + 1, _SUBLANE):
        if footprint(tb) > vmem_budget:
            continue
        b_pad = _round_up(B, tb)
        cost = b_pad + (b_pad // tb) * _STEP_OVERHEAD_ROWS
        if best_cost is None or cost < best_cost or (cost == best_cost and tb > best_tb):
            best_tb, best_cost = tb, cost
    return best_tb


def init_fc_body_params(key, state_dim, hidden_units=(64, 64)):
    """Mirrors layer_init(nn.Linear(...)): orthogonal weights, zero bias.

    Returns a list of (w, b) with w: [dim_in, dim_out], b: [dim_out]
    (transpose of PyTorch's [out, in] so the kernel computes y = x @ W + b).
    """
    dims = (state_dim,) + tuple(hidden_units)
    params = []
    for dim_in, dim_out in zip(dims[:-1], dims[1:]):
        key, wk = jax.random.split(key)
        w = jax.nn.initializers.orthogonal(scale=1.0)(wk, (dim_in, dim_out), jnp.float32)
        b = jnp.zeros((dim_out,), jnp.float32)
        params.append((w, b))
    return params


def prepare_fc_body_params(params, state_dim, param_dtype=jnp.float32):
    """One-time prep: cast (optionally bf16 for v6e/v7x) and zero-pad feature
    dims to multiples of 8 (usually a no-op).  Returns (padded_params, dims)
    with dims the TRUE layer widths (static ints) used for any final slicing."""
    dims = (int(state_dim),) + tuple(int(w.shape[1]) for w, _ in params)
    dims8 = tuple(_round_up(d, _SUBLANE) for d in dims)
    padded = []
    for (w, b), di8, do8 in zip(params, dims8[:-1], dims8[1:]):
        di, do = int(w.shape[0]), int(w.shape[1])
        w_p = w.astype(param_dtype)
        b_p = b.astype(param_dtype).reshape(1, do)
        if (di8, do8) != (di, do):
            w_p = jnp.zeros((di8, do8), param_dtype).at[:di, :do].set(w_p)
            b_p = jnp.zeros((1, do8), param_dtype).at[:, :do].set(b_p)
        padded.append((w_p, b_p))
    return padded, dims


@functools.partial(jax.jit, static_argnums=(2,))
def fc_body_forward(x, padded_params, dims):
    """FCBody.forward: relu(linear(...)) over all layers, fused in one kernel."""
    B = x.shape[0]
    assert x.shape[1] == dims[0]
    num_layers = len(padded_params)
    dims8 = tuple(_round_up(d, _SUBLANE) for d in dims)
    d_in8, d_out8 = dims8[0], dims8[-1]

    x_itemsize = jnp.dtype(x.dtype).itemsize
    p_itemsize = jnp.dtype(padded_params[0][0].dtype).itemsize
    vmem_limit = _vmem_limit_bytes()
    budget = max(vmem_limit - (4 << 20), 2 << 20)

    tb = _choose_batch_tile(B, dims8, x_itemsize, p_itemsize, budget)
    b_pad = _round_up(B, tb)
    num_tiles = b_pad // tb

    # Pad x only if actually required (rows to the batch tile, cols to /8).
    pad_rows = b_pad - B
    pad_cols = d_in8 - dims[0]
    if pad_rows or pad_cols:
        x_in = jnp.pad(x, ((0, pad_rows), (0, pad_cols)))
    else:
        x_in = x

    in_specs = [pl.BlockSpec((tb, d_in8), lambda i: (i, 0))]
    operands = [x_in]
    for w_p, b_p in padded_params:
        # Constant index_map -> weights/biases resident in VMEM across batch tiles.
        in_specs.append(pl.BlockSpec(w_p.shape, lambda i: (0, 0)))
        in_specs.append(pl.BlockSpec(b_p.shape, lambda i: (0, 0)))
        operands.extend([w_p, b_p])

    out = pl.pallas_call(
        _make_fused_fc_kernel(num_layers),
        out_shape=jax.ShapeDtypeStruct((b_pad, d_out8), x.dtype),
        grid=(num_tiles,),
        in_specs=in_specs,
        out_specs=pl.BlockSpec((tb, d_out8), lambda i: (i, 0)),
        compiler_params=pltpu.CompilerParams(
            dimension_semantics=("parallel",),   # v7x: 2 TCs split the batch tiles
            vmem_limit_bytes=vmem_limit,
        ),
    )(*operands)

    # Slice only when padding actually happened (no-op / zero traffic otherwise).
    if b_pad != B or d_out8 != dims[-1]:
        out = out[:B, : dims[-1]]
    return out


def _reference_forward(x, params):
    for w, b in params:
        x = jnp.maximum(x @ w + b[None, :], 0.0)
    return x


# TODO(synk): use_noisy_linear=True (NoisyLinear + reset_noise) path not implemented;
# only the default nn.Linear + F.relu forward is translated.


if __name__ == "__main__":
    key = jax.random.PRNGKey(0)
    k_in, k_params = jax.random.split(key)

    batch = 8
    state_dim = 16
    hidden_units = (32, 32)

    x = jax.random.normal(k_in, (batch, state_dim), jnp.float32)
    params = init_fc_body_params(k_params, state_dim, hidden_units)
    padded_params, dims = prepare_fc_body_params(params, state_dim)

    out = fc_body_forward(x, padded_params, dims)
    out = jax.block_until_ready(out)

    ref = _reference_forward(x, params)
    assert out.shape == (batch, hidden_units[-1])
    assert jnp.allclose(out, ref, atol=1e-5, rtol=1e-5)

    print("KERNEL_OK")
</pallas_src>

<mosaic_0001>
module attributes {stable_mosaic.version = 11 : i64} {
  func.func @kernel(%arg0: i32, %arg1: memref<8x16xf32, #tpu.memory_space<vmem>>, %arg2: memref<16x32xf32, #tpu.memory_space<vmem>>, %arg3: memref<1x32xf32, #tpu.memory_space<vmem>>, %arg4: memref<32x32xf32, #tpu.memory_space<vmem>>, %arg5: memref<1x32xf32, #tpu.memory_space<vmem>>, %arg6: memref<8x32xf32, #tpu.memory_space<vmem>>) attributes {dimension_semantics = [#tpu.dimension_semantics<parallel>], iteration_bounds = array<i64: 1>, scalar_prefetch = 0 : i64, scratch_operands = 0 : i64, tpu.core_type = #tpu.core_type<tc>, window_params = [{transform_indices = @transform_0, window_bounds = array<i64: 8, 16>}, {pipeline_mode = #tpu.pipeline_mode<synchronous>, transform_indices = @transform_1, window_bounds = array<i64: 16, 32>}, {pipeline_mode = #tpu.pipeline_mode<synchronous>, transform_indices = @transform_2, window_bounds = array<i64: 1, 32>}, {pipeline_mode = #tpu.pipeline_mode<synchronous>, transform_indices = @transform_3, window_bounds = array<i64: 32, 32>}, {pipeline_mode = #tpu.pipeline_mode<synchronous>, transform_indices = @transform_4, window_bounds = array<i64: 1, 32>}, {transform_indices = @transform_5, window_bounds = array<i64: 8, 32>}]} {
    %c0 = arith.constant 0 : index
    %c0_0 = arith.constant 0 : index
    %0 = vector.load %arg1[%c0, %c0_0] : memref<8x16xf32, #tpu.memory_space<vmem>>, vector<8x16xf32>
    %c0_1 = arith.constant 0 : index
    %c0_2 = arith.constant 0 : index
    %1 = vector.load %arg2[%c0_1, %c0_2] : memref<16x32xf32, #tpu.memory_space<vmem>>, vector<16x32xf32>
    %c0_3 = arith.constant 0 : index
    %c0_4 = arith.constant 0 : index
    %2 = vector.load %arg3[%c0_3, %c0_4] : memref<1x32xf32, #tpu.memory_space<vmem>>, vector<1x32xf32>
    %cst = arith.constant dense<0.000000e+00> : vector<8x32xf32>
    %3 = tpu.matmul %0, %1, %cst {dimension_numbers = #tpu.dot_dimension_numbers<[1], [0], [0], [1], [0, 0, 1, 1], [], []>} : vector<8x16xf32>, vector<16x32xf32>, vector<8x32xf32> -> vector<8x32xf32>
    %4 = vector.broadcast %2 : vector<1x32xf32> to vector<8x32xf32>
    %5 = arith.addf %3, %4 : vector<8x32xf32>
    %cst_5 = arith.constant 0.000000e+00 : f32
    %6 = vector.broadcast %cst_5 : f32 to vector<8x32xf32>
    %7 = arith.maximumf %5, %6 : vector<8x32xf32>
    %c0_6 = arith.constant 0 : index
    %c0_7 = arith.constant 0 : index
    %8 = vector.load %arg4[%c0_6, %c0_7] : memref<32x32xf32, #tpu.memory_space<vmem>>, vector<32x32xf32>
    %c0_8 = arith.constant 0 : index
    %c0_9 = arith.constant 0 : index
    %9 = vector.load %arg5[%c0_8, %c0_9] : memref<1x32xf32, #tpu.memory_space<vmem>>, vector<1x32xf32>
    %cst_10 = arith.constant dense<0.000000e+00> : vector<8x32xf32>
    %10 = tpu.matmul %7, %8, %cst_10 {dimension_numbers = #tpu.dot_dimension_numbers<[1], [0], [0], [1], [0, 0, 1, 1], [], []>} : vector<8x32xf32>, vector<32x32xf32>, vector<8x32xf32> -> vector<8x32xf32>
    %11 = vector.broadcast %9 : vector<1x32xf32> to vector<8x32xf32>
    %12 = arith.addf %10, %11 : vector<8x32xf32>
    %cst_11 = arith.constant 0.000000e+00 : f32
    %13 = vector.broadcast %cst_11 : f32 to vector<8x32xf32>
    %14 = arith.maximumf %12, %13 : vector<8x32xf32>
    %c0_12 = arith.constant 0 : index
    %c0_13 = arith.constant 0 : index
    %15 = vector.load %arg6[%c0_12, %c0_13] : memref<8x32xf32, #tpu.memory_space<vmem>>, vector<8x32xf32>
    tpu.vector_store %arg6[%c0_12, %c0_13], %14 {strides = array<i32>} : memref<8x32xf32, #tpu.memory_space<vmem>>, vector<8x32xf32>,
    return
  }
  func.func @transform_0(%arg0: i32) -> (i32, i32) {
    %c0_i32 = arith.constant 0 : i32
    %c0_i32_0 = arith.constant 0 : i32
    return %arg0, %c0_i32 : i32, i32
  }
  func.func @transform_1(%arg0: i32) -> (i32, i32) {
    %c0_i32 = arith.constant 0 : i32
    %c0_i32_0 = arith.constant 0 : i32
    %c0_i32_1 = arith.constant 0 : i32
    return %c0_i32, %c0_i32_0 : i32, i32
  }
  func.func @transform_2(%arg0: i32) -> (i32, i32) {
    %c0_i32 = arith.constant 0 : i32
    %c0_i32_0 = arith.constant 0 : i32
    %c0_i32_1 = arith.constant 0 : i32
    return %c0_i32, %c0_i32_0 : i32, i32
  }
  func.func @transform_3(%arg0: i32) -> (i32, i32) {
    %c0_i32 = arith.constant 0 : i32
    %c0_i32_0 = arith.constant 0 : i32
    %c0_i32_1 = arith.constant 0 : i32
    return %c0_i32, %c0_i32_0 : i32, i32
  }
  func.func @transform_4(%arg0: i32) -> (i32, i32) {
    %c0_i32 = arith.constant 0 : i32
    %c0_i32_0 = arith.constant 0 : i32
    %c0_i32_1 = arith.constant 0 : i32
    return %c0_i32, %c0_i32_0 : i32, i32
  }
  func.func @transform_5(%arg0: i32) -> (i32, i32) {
    %c0_i32 = arith.constant 0 : i32
    %c0_i32_0 = arith.constant 0 : i32
    return %arg0, %c0_i32 : i32, i32
  }
}

</mosaic_0001>

<bundles_post_ra>
// kernel: fc_body_forward.1
= control target key start
LH: loop header
LB: loop body
LE: loop exit
PB: predicated region body
PF: predicated region fallthrough
CT: control target
= control target key end

     0   :  { %10 = vsyncpa [#allocation3], 0  ;;  %s489_s0 = inlined_call_operand.hbm [shape: f32[8,16], index: 0, kind: input, shape index: {}]   ;;  %s490_s1 = inlined_call_operand.hbm [shape: f32[16,32], index: 1, kind: input, shape index: {}]   ;;  %s491_s2 = inlined_call_operand.vmem [shape: f32[1,32], index: 2, kind: input, shape index: {}]   ;;  %s492_s3 = inlined_call_operand.hbm [shape: f32[32,32], index: 3, kind: input, shape index: {}]   ;;  %s493_s4 = inlined_call_operand.vmem [shape: f32[1,32], index: 4, kind: input, shape index: {}]   ;;  %s494_s5 = inlined_call_operand.hbm [shape: f32[8,32], index: 5, kind: output, shape index: {}]  }
   0x1   :  { %11 = vsyncpa [#allocation6], 0 }
   0x2   :  { %12 = vsyncpa [#allocation4], 0  ;;  %s390_s18 = smov [#allocation5]   ;;  %s296_s22 = scalar_lea.hbm %s490_s1, 256 }
   0x3   :  { %s28_s19 = sshll.u32 %s390_s18, 4  ;;  %p297_p0 = scmp.ne.s32.totalorder %s490_s1, %s296_s22  ;;  %s29_s19 = int_to_ptr.vmem [resolvable:$true] %s28_s19 }
   0x4   :  { %p300_p1 = scmp.lt.u32.totalorder %s296_s22, %s490_s1 }
   0x6   :  { %p302_p2 = pnand %p300_p1, %p297_p0 }
   0x8   :  { %305 = shalt.err (!%p302_p2)
}
   0x9   :  { %s306_s27 = scalar_lea.vmem %s29_s19, 256  ;;  %p311_p4 = scmp.lt.s32.totalorder %s29_s19, %s29_s19 }
   0xa   :  { %p307_p3 = scmp.ne.s32.totalorder %s29_s19, %s306_s27  ;;  %p312_p5 = scmp.lt.s32.totalorder %s306_s27, %s306_s27 }
   0xc   :  { %p313_p6 = por %p312_p5, %p311_p4 }
   0xe   :  { %p314_p7 = pnand %p313_p6, %p307_p3 }
  0x10   :  { %317 = shalt.err (!%p314_p7)
}
  0x11   :  { %s391_s28 = smov 128   ;;  %s392_s29 = smov 8  }
  0x12   :  { %34 = dma.hbm_to_vmem [thread:$0]  %s490_s1, 256, %s29_s19, [#allocation6], %s391_s28, %s391_s28, %s392_s29  }
  0x13   :  { %s393_s7 = smov [#allocation2]   ;;  %s394_s9 = smov [#allocation7]  }
  0x14   :  { %s19_s8 = sshll.u32 %s393_s7, 4  ;;  %s42_s10 = sshll.u32 %s394_s9, 4  ;;  %s20_s8 = int_to_ptr.vmem [resolvable:$true] %s19_s8  ;;  %s43_s10 = int_to_ptr.vmem [resolvable:$true] %s42_s10 }
  0x15   :  { %s318_s13 = scalar_lea.hbm %s489_s0, 128 }
  0x16   :  { %p319_p8 = scmp.ne.s32.totalorder %s489_s0, %s318_s13  ;;  %p322_p9 = scmp.lt.u32.totalorder %s318_s13, %s489_s0 }
  0x18   :  { %p324_p10 = pnand %p322_p9, %p319_p8 }
  0x1a   :  { %327 = shalt.err (!%p324_p10)
}
  0x1b   :  { %s328_s1 = scalar_lea.vmem %s20_s8, 128  ;;  %p333_p12 = scmp.lt.s32.totalorder %s20_s8, %s20_s8 }
  0x1c   :  { %p329_p11 = scmp.ne.s32.totalorder %s20_s8, %s328_s1  ;;  %p334_p13 = scmp.lt.s32.totalorder %s328_s1, %s328_s1 }
  0x1e   :  { %p335_p0 = por %p334_p13, %p333_p12 }
  0x20   :  { %p336_p1 = pnand %p335_p0, %p329_p11 }
  0x22   :  { %339 = shalt.err (!%p336_p1)
}
  0x23   :  { %22 = dma.hbm_to_vmem [thread:$0]  %s489_s0, 128, %s20_s8, [#allocation3]  }
  0x24   :  { %s340_s22 = scalar_lea.hbm %s492_s3, 512 }
  0x25   :  { %p341_p2 = scmp.ne.s32.totalorder %s492_s3, %s340_s22  ;;  %p344_p3 = scmp.lt.u32.totalorder %s340_s22, %s492_s3 }
  0x27   :  { %p346_p4 = pnand %p344_p3, %p341_p2 }
  0x29   :  { %349 = shalt.err (!%p346_p4)
}
  0x2a   :  { %s350_s27 = scalar_lea.vmem %s43_s10, 512  ;;  %p355_p6 = scmp.lt.s32.totalorder %s43_s10, %s43_s10 }
  0x2b   :  { %p351_p5 = scmp.ne.s32.totalorder %s43_s10, %s350_s27  ;;  %p356_p7 = scmp.lt.s32.totalorder %s350_s27, %s350_s27 }
  0x2d   :  { %p357_p8 = por %p356_p7, %p355_p6 }
  0x2f   :  { %p358_p9 = pnand %p357_p8, %p351_p5 }
  0x31   :  { %361 = shalt.err (!%p358_p9)
}
  0x32   :  { %48 = dma.hbm_to_vmem [thread:$0]  %s492_s3, 512, %s43_s10, [#allocation6], %s391_s28, %s391_s28, %s392_s29  }
  0x33   :  { %384 = dma.done.wait [#allocation3], 128  }
  0x34   :  { %385 = vsyncadd [#allocation3], 4294967168 }
  0x35   :  { %386 = dma.done.wait [#allocation6], 768  }
  0x36   :  { %387 = vsyncadd [#allocation6], 4294966528  ;;  %v395_v0 = vmov 0.0|0.0   ;;  %vm396_vm0 = vmmov 0   ;;  %v397_v1 = vmov 0.0   ;;  %v61_v2 = vld [vmem:[#allocation5] sm:$0xff] }
  0x37   :  { %278 = vmatprep.subr.bf16.mxu0 %v395_v0  ;;  %264 = vmatprep.mubr.msk.f32.mxu0 %vm396_vm0, %v397_v1  ;;  %v62_v3 = vld [vmem:[#allocation5 + $0x8] sm:$0xff]  ;;  %v145_v5 = vld [vmem:[#allocation7] sm:$0xff]  ;;  %v146_v6 = vld [vmem:[#allocation7 + $0x8] sm:$0xff]  ;;  %vm70_vm1 = vcmask 130048   ;;  %vm156_vm2 = vcmask 261120   ;;  %s398_s7 = smov [#allocation8]  }
  0x38   :  { %281 = vmatprep.subr.bf16.mxu1 %v395_v0  ;;  %275 = vmatprep.mubr.msk.f32.mxu1 %vm396_vm0, %v397_v1  ;;  %v279_v4 = vpack.c.bf16 %v62_v3, %v61_v2  ;;  %v282_v7 = vpack.c.bf16 %v146_v6, %v145_v5  ;;  %v60_v8 = vld [vmem:[#allocation2] sm:$0xff]  ;;  %v147_v9 = vld [vmem:[#allocation7 + $0x10] sm:$0xff]  ;;  %v148_v10 = vld [vmem:[#allocation7 + $0x18] sm:$0xff]  ;;  %s238_s8 = sshll.u32 %s398_s7, 4  ;;  %s239_s8 = int_to_ptr.vmem [resolvable:$true] %s238_s8 }
  0x39   :  { %v285_v11 = vpack.c.bf16 %v148_v10, %v147_v9  ;;  %v248_v12 = vld [vmem:[%s491_s2] ss:$0 sm:$0xff]  ;;  %s362_s9 = scalar_lea.vmem %s239_s8, 128  ;;  %p367_p11 = scmp.lt.s32.totalorder %s239_s8, %s239_s8 }
  0x3a   :  { %280 = vmatpush3.bf16.msra.mxu0 %v279_v4  ;;  %283 = vmatpush3.bf16.msra.mxu1 %v282_v7  ;;  %v250_v17 = vld [vmem:[%s493_s4] ss:$0 sm:$0xff]  ;;  %p363_p10 = scmp.ne.s32.totalorder %s239_s8, %s362_s9  ;;  %p368_p12 = scmp.lt.s32.totalorder %s362_s9, %s362_s9 }
  0x3b   :  { %284 = vmatprep.subr.bf16.mxu1 %v395_v0 }
  0x3c   :  { %p369_p13 = por %p368_p12, %p367_p11 }
  0x3d   :  { %265 = vmatmul.mubr.msk.f32.vlgmr.msra.gmra.mrb[0].mxu0 %vm70_vm1, %v60_v8 }
  0x3e   :  { %286 = vmatpush3.bf16.msra.mxu1 %v285_v11  ;;  %p370_p0 = pnand %p369_p13, %p363_p10 }
 0x110   :  { %v140_v13 = vpop.f32.mrb[0].mxu0 }
 0x111   :  { %v141_v14 = vadd.f32 %v248_v12, %v140_v13  ;;  %v266_v15 = vpop.f32.mrb[1].mxu0 }
 0x113   :  { %v144_v16 = vmax.f32 %v141_v14, 0.0 }
 0x115   :  { %276 = vmatmul.mubr.msk.f32.vlgmr.msra.gmra.mrb[0].mxu1 %vm156_vm2, %v144_v16 }
 0x1e8   :  { %v226_v18 = vpop.f32.mrb[0].mxu1 }
 0x1e9   :  { %v227_v19 = vadd.f32 %v250_v17, %v226_v18  ;;  %v277_v20 = vpop.f32.mrb[1].mxu1 }
 0x1eb   :  { %v230_v21 = vmax.f32 %v227_v19, 0.0 }
 0x1ed   :  { %231 = vst.msk [vmem:[#allocation8] sm:$0xff] %vm156_vm2, %v230_v21 }
 0x1ee   :  { %373 = shalt.err (!%p370_p0)
}
 0x1ef   :  { %s374_s11 = scalar_lea.hbm %s494_s5, 128 }
 0x1f0   :  { %p375_p1 = scmp.ne.s32.totalorder %s494_s5, %s374_s11  ;;  %p378_p2 = scmp.lt.u32.totalorder %s374_s11, %s494_s5 }
 0x1f2   :  { %p380_p3 = pnand %p378_p2, %p375_p1 }
 0x1f4   :  { %383 = shalt.err (!%p380_p3)
}
 0x1f5   :  { %241 = dma.vmem_to_hbm [thread:$0]  %s239_s8, 128, %s494_s5, [#allocation4]  }
 0x1f6   :  { %388 = dma.done.wait [#allocation4], 128  }
 0x1f7   :  { %389 = vsyncadd [#allocation4], 4294967168 }
 0x1f8   :  { %245 = vsyncpa [#allocation3], 1 }
 0x1f9   :  { %246 = vsyncpa [#allocation6], 1 }
 0x1fa   :  { %247 = vsyncpa [#allocation4], 1 }

</bundles_post_ra>
